<compile_context>
chip_gen: v5e
topology: v5e:2x2
jax: 0.10.0
libtpu: 0.0.40
codegen_flags: <defaults>
</compile_context>

<pallas_src>
import jax
import jax.numpy as jnp
from jax.experimental import pallas as pl
from jax.experimental.pallas import tpu as pltpu

_LANES = 128
_TARGET_BLOCK_BYTES = 4 * 1024 * 1024  # 4 MiB/block; 2 bufs x (in+out) ~= 16 MiB VMEM


def _dropout_residual_hw_kernel(seed_ref, x_ref, o_ref):
    """out = x + dropout_train(x, p=0.5) = where(keep, 3*x, x), HW PRNG path."""
    # Per-tile seed so every grid step draws an independent, reproducible mask.
    pltpu.prng_seed(seed_ref[0] + pl.program_id(0))
    bits = pltpu.prng_random_bits(x_ref.shape)
    keep = (bits & 1) != 0           # one random bit -> Bernoulli(0.5)
    x = x_ref[...]
    o_ref[...] = jnp.where(keep, x * 3.0, x)   # 1 mul + 1 select


def _dropout_residual_sw_kernel(seed_ref, x_ref, o_ref):
    """Portable fallback (interpret / non-TPU): trimmed splitmix32 hash."""
    tile_rows, lanes = x_ref.shape
    # Scalar per-tile/seed offset folded into one combined linear-index iota.
    offset = (pl.program_id(0).astype(jnp.uint32) * jnp.uint32(tile_rows * lanes)
              + seed_ref[0].astype(jnp.uint32) * jnp.uint32(0x9E3779B9))
    rid = jax.lax.broadcasted_iota(jnp.int32, (tile_rows, lanes), 0).astype(jnp.uint32)
    cid = jax.lax.broadcasted_iota(jnp.int32, (tile_rows, lanes), 1).astype(jnp.uint32)
    h = rid * jnp.uint32(lanes) + cid + offset
    h = (h ^ (h >> 16)) * jnp.uint32(0x7FEB352D)
    h = (h ^ (h >> 15)) * jnp.uint32(0x846CA68B)
    keep = ((h ^ (h >> 16)) >> 31) == jnp.uint32(1)
    x = x_ref[...]
    o_ref[...] = jnp.where(keep, x * 3.0, x)


def _round_up(a: int, b: int) -> int:
    return ((a + b - 1) // b) * b


def _choose_tile_rows(rows: int, itemsize: int) -> int:
    # Minimum sublane tile: f32 -> 8, bf16 -> 16, int8/fp8 -> 32.
    sublane = max(8, 32 // itemsize)
    target = max(sublane, _TARGET_BLOCK_BYTES // (_LANES * itemsize))
    tile = _round_up(min(target, rows), sublane)
    # Guarantee >= 2 grid steps when possible so v7x's 2 TCs both get work.
    if rows > sublane and pl.cdiv(rows, tile) < 2:
        tile = max(sublane, _round_up(-(-rows // 2), sublane))
    return tile


def resnet_forward(x: jax.Array, seed: int = 0) -> jax.Array:
    """x: any-shape float tensor (NCHW in the demo). Returns x + dropout_train(x)."""
    orig_shape = x.shape
    dtype = x.dtype
    n = x.size
    itemsize = jnp.dtype(dtype).itemsize

    sublane = max(8, 32 // itemsize)
    rows = _round_up(-(-n // _LANES), sublane)   # lane-dense slab, sublane-aligned
    padded_n = rows * _LANES

    xf = x.reshape(-1)
    if padded_n != n:
        # Tiny tail pad (< one sublane group); the common n % 128 == 0 ResNet
        # activation case takes the zero-copy path below.
        xf = jnp.pad(xf, (0, padded_n - n))
    x2d = xf.reshape(rows, _LANES)

    tile_rows = _choose_tile_rows(rows, itemsize)
    grid = (pl.cdiv(rows, tile_rows),)

    on_tpu = jax.default_backend() == "tpu"
    kernel = _dropout_residual_hw_kernel if on_tpu else _dropout_residual_sw_kernel
    seed_arr = jnp.array([seed], dtype=jnp.int32)

    out2d = pl.pallas_call(
        kernel,
        out_shape=jax.ShapeDtypeStruct((rows, _LANES), dtype),
        grid_spec=pltpu.PrefetchScalarGridSpec(
            num_scalar_prefetch=1,
            grid=grid,
            in_specs=[pl.BlockSpec((tile_rows, _LANES), lambda i, _s: (i, 0))],
            out_specs=pl.BlockSpec((tile_rows, _LANES), lambda i, _s: (i, 0)),
        ),
        compiler_params=pltpu.CompilerParams(
            dimension_semantics=("parallel",),
            vmem_limit_bytes=32 * 1024 * 1024,  # raises v5e's 16 MiB scoped default
        ),
        cost_estimate=pl.CostEstimate(
            flops=2 * n,
            transcendentals=0,
            bytes_accessed=2 * n * itemsize,
        ),
    )(seed_arr, x2d)

    if padded_n != n:
        return out2d.reshape(-1)[:n].reshape(orig_shape)
    return out2d.reshape(orig_shape)


if __name__ == "__main__":
    key = jax.random.PRNGKey(0)
    x = jax.random.normal(key, (2, 4, 16, 16), dtype=jnp.float32)

    out = jax.block_until_ready(resnet_forward(x, seed=1234))

    # Shape preserved; every element is either x (dropped) or 3*x (kept).
    assert out.shape == x.shape
    denom = jnp.where(x == 0, 1.0, x)
    ratio = out / denom
    is_drop = jnp.isclose(ratio, 1.0)
    is_keep = jnp.isclose(ratio, 3.0)
    ok = jnp.all(is_drop | is_keep | (x == 0))
    assert bool(ok), "every element must be x (dropped) or 3*x (kept)"

    # Mask should be roughly Bernoulli(0.5), not degenerate.
    # TODO(synk): mask is reproducible from `seed` but will not match PyTorch's RNG stream.
    keep_frac = float(jnp.mean(jnp.where(x != 0, is_keep, 0.5)))
    assert 0.2 < keep_frac < 0.8, f"keep fraction {keep_frac} not ~0.5"

    print("KERNEL_OK")
</pallas_src>

<mosaic_0001>
module attributes {stable_mosaic.version = 11 : i64} {
  func.func @_dropout_residual_sw_kernel(%arg0: i32, %arg1: memref<1xi32, #tpu.memory_space<smem>>, %arg2: memref<8x128xf32, #tpu.memory_space<vmem>>, %arg3: memref<8x128xf32, #tpu.memory_space<vmem>>) attributes {dimension_semantics = [#tpu.dimension_semantics<parallel>], iteration_bounds = array<i64: 2>, scalar_prefetch = 1 : i64, scratch_operands = 0 : i64, tpu.core_type = #tpu.core_type<tc>, window_params = [{transform_indices = @transform_0, window_bounds = array<i64: 8, 128>}, {transform_indices = @transform_1, window_bounds = array<i64: 8, 128>}]} {
    %c1024_i32 = arith.constant 1024 : i32
    %0 = arith.muli %arg0, %c1024_i32 : i32
    %c0 = arith.constant 0 : index
    %1 = memref.load %arg1[%c0] : memref<1xi32, #tpu.memory_space<smem>>
    %c-1640531527_i32 = arith.constant -1640531527 : i32
    %2 = arith.muli %1, %c-1640531527_i32 : i32
    %3 = arith.addi %0, %2 : i32
    %4 = tpu.iota {dimensions = array<i32: 0>} : vector<8x128xi32>
    %5 = tpu.iota {dimensions = array<i32: 1>} : vector<8x128xi32>
    %c128_i32 = arith.constant 128 : i32
    %6 = vector.broadcast %c128_i32 : i32 to vector<8x128xi32>
    %7 = arith.muli %4, %6 : vector<8x128xi32>
    %8 = arith.addi %7, %5 : vector<8x128xi32>
    %9 = vector.broadcast %3 : i32 to vector<8x128xi32>
    %10 = arith.addi %8, %9 : vector<8x128xi32>
    %c16_i32 = arith.constant 16 : i32
    %11 = vector.broadcast %c16_i32 : i32 to vector<8x128xi32>
    %12 = arith.shrui %10, %11 : vector<8x128xi32>
    %13 = arith.xori %10, %12 : vector<8x128xi32>
    %c2146121005_i32 = arith.constant 2146121005 : i32
    %14 = vector.broadcast %c2146121005_i32 : i32 to vector<8x128xi32>
    %15 = arith.muli %13, %14 : vector<8x128xi32>
    %c15_i32 = arith.constant 15 : i32
    %16 = vector.broadcast %c15_i32 : i32 to vector<8x128xi32>
    %17 = arith.shrui %15, %16 : vector<8x128xi32>
    %18 = arith.xori %15, %17 : vector<8x128xi32>
    %c-2073254261_i32 = arith.constant -2073254261 : i32
    %19 = vector.broadcast %c-2073254261_i32 : i32 to vector<8x128xi32>
    %20 = arith.muli %18, %19 : vector<8x128xi32>
    %c16_i32_0 = arith.constant 16 : i32
    %21 = vector.broadcast %c16_i32_0 : i32 to vector<8x128xi32>
    %22 = arith.shrui %20, %21 : vector<8x128xi32>
    %23 = arith.xori %20, %22 : vector<8x128xi32>
    %c31_i32 = arith.constant 31 : i32
    %24 = vector.broadcast %c31_i32 : i32 to vector<8x128xi32>
    %25 = arith.shrui %23, %24 : vector<8x128xi32>
    %c1_i32 = arith.constant 1 : i32
    %26 = vector.broadcast %c1_i32 : i32 to vector<8x128xi32>
    %27 = arith.cmpi eq, %25, %26 : vector<8x128xi32>
    %c0_1 = arith.constant 0 : index
    %c0_2 = arith.constant 0 : index
    %28 = vector.load %arg2[%c0_1, %c0_2] : memref<8x128xf32, #tpu.memory_space<vmem>>, vector<8x128xf32>
    %cst = arith.constant 3.000000e+00 : f32
    %29 = vector.broadcast %cst : f32 to vector<8x128xf32>
    %30 = arith.mulf %28, %29 : vector<8x128xf32>
    %31 = arith.select %27, %30, %28 : vector<8x128xi1>, vector<8x128xf32>
    %c0_3 = arith.constant 0 : index
    %c0_4 = arith.constant 0 : index
    %32 = vector.load %arg3[%c0_3, %c0_4] : memref<8x128xf32, #tpu.memory_space<vmem>>, vector<8x128xf32>
    tpu.vector_store %arg3[%c0_3, %c0_4], %31 {strides = array<i32>} : memref<8x128xf32, #tpu.memory_space<vmem>>, vector<8x128xf32>,
    return
  }
  func.func @transform_0(%arg0: i32, %arg1: memref<1xi32, #tpu.memory_space<smem>>) -> (i32, i32) {
    %c0_i32 = arith.constant 0 : i32
    %c0_i32_0 = arith.constant 0 : i32
    return %arg0, %c0_i32 : i32, i32
  }
  func.func @transform_1(%arg0: i32, %arg1: memref<1xi32, #tpu.memory_space<smem>>) -> (i32, i32) {
    %c0_i32 = arith.constant 0 : i32
    %c0_i32_0 = arith.constant 0 : i32
    return %arg0, %c0_i32 : i32, i32
  }
}

</mosaic_0001>

<bundles_post_ra>
// kernel: tpu_custom_call.1
= control target key start
LH: loop header
LB: loop body
LE: loop exit
PB: predicated region body
PF: predicated region fallthrough
CT: control target
= control target key end

     0   :  { %s551_s0 = inlined_call_operand.<no memory space> [shape: s32[1], index: 0, kind: input, shape index: {}]   ;;  %s552_s1 = inlined_call_operand.hbm [shape: f32[16,128], index: 1, kind: input, shape index: {}]   ;;  %s553_s2 = inlined_call_operand.hbm [shape: f32[16,128], index: 2, kind: output, shape index: {}]  }
   0x1   :  { %7 = sst [smem:[#allocation3]] %s551_s0 }
   0x2   :  { %8 = vsyncpa [#allocation5], 0 }
   0x3   :  { %10 = vsyncpa [#allocation5 + $0x1], 0 }
   0x4   :  { %11 = vsyncpa [#allocation6], 0 }
   0x5   :  { %13 = vsyncpa [#allocation6 + $0x1], 0  ;;  %s423_s11 = smov 0   ;;  %s425_s12 = smov 0  }
   0x6   :  { %s427_s13 = smov 0   ;;  %s429_s14 = smov 0  }
   0x7 LB: > { %s444_s0 = sadd.s32 4294967295, %s403_s14   ;;  %s248_s15 = sadd.s32 4294967294, %s403_s14   ;;  %s403_s14 = sphi %s429_s14, %s563_s14   ;;  %s399_s13 = sphi %s427_s13, %s562_s13   ;;  %s395_s12 = sphi %s425_s12, %s561_s12   ;;  %s391_s11 = sphi %s423_s11, %s560_s11  }
   0x8   : > { %s448_s16 = sadd.s32 1, %s403_s14   ;;  %s26_s17 = sadd.s32 1, %s399_s13 }
   0x9   : > { %s23_s18 = ssub.s32 %s403_s14, %s448_s16  ;;  %p33_p0 = scmp.ne.s32.totalorder %s399_s13, %s395_s12 }
   0xa   : > { %p24_p1 = scmp.eq.s32.totalorder %s23_s18, 0  ;;  %p34_p2 = scmp.eq.s32.totalorder %s403_s14, 0 }
   0xb   : > { %p39_p3 = scmp.ne.s32.totalorder %s395_s12, %s391_s11  ;;  %p40_p4 = scmp.eq.s32.totalorder %s444_s0, 0 }
   0xc   : > { %s460_s19 = scalar_select %p24_p1, %s399_s13, %s26_s17  }
   0xd   : > { %p462_p5 = por %p34_p2, %p33_p0  ;;  %p466_p6 = por %p40_p4, %p39_p3 }
   0xe   : > { %p63_p7 = scmp.eq.s32.totalorder %s444_s0, 1  ;;  %p69_p8 = scmp.eq.s32.totalorder %s248_s15, 1 }
   0xf   : > { %p273_p10 = scmp.lt.s32.totalorder %s403_s14, 2  ;;  %s89_s24 = sand.u32 1, %s399_s13  }
  0x10   : > { %p473_p11 = por %p63_p7, %p33_p0  ;;  %p477_p12 = por %p69_p8, %p39_p3 }
  0x11   : > { %s252_s25 = sshll.u32 %s403_s14, 3  ;;  %s251_s26 = sshll.u32 %s89_s24, 3 }
  0x12   : > { %s97_s29 = scalar_lea.hbm %s552_s1, %s252_s25  ;;  %s93_s3 = scalar_lea.vmem [#allocation4], %s251_s26 }
  0x13   : > { %s99_s30 = sshll.u32 %s97_s29, 4  ;;  %s101_s4 = sshll.u32 %s93_s3, 4  ;;  %s100_s30 = int_to_ptr.hbm [resolvable:$true] %s99_s30  ;;  %s102_s4 = int_to_ptr.vmem [resolvable:$true] %s101_s4 }
  0x14   : > { %p488_p13 = pnand %p273_p10, %p462_p5  ;;  %p253_p0 = scmp.ge.s32.totalorder %s403_s14, 1 }
  0x15   : > { %p106_p1 = scmp.lt.s32.totalorder %s403_s14, 3  ;;  %s90_s6 = scalar_lea.sflag [#allocation5], %s89_s24 }
  0x16   : > { %s307_s7 = sshra.s32 %s100_s30, 4  ;;  %p311_p3 = pneg %p488_p13  ;;  %s308_s7 = int_to_ptr.hbm [resolvable:$true] %s307_s7 }
  0x17   : > { %s309_s8 = scalar_lea.hbm %s308_s7, 8  ;;  %s314_s15 = scalar_lea.hbm %s552_s1, 16 }
  0x18   : > { %p310_p2 = scmp.ne.s32.totalorder %s308_s7, %s309_s8  ;;  %p315_p5 = scmp.lt.s32.totalorder %s308_s7, %s552_s1 }
  0x19   : > { %p316_p8 = scmp.lt.s32.totalorder %s314_s15, %s309_s8 }
  0x1a   : > { %p312_p4 = pnand %p311_p3, %p310_p2 }
  0x1b   : > { %p317_p10 = por %p316_p8, %p315_p5 }
  0x1c   : > { %p313_p7 = pneg %p312_p4 }
  0x1e   : > { %p318_p9 = pnand %p317_p10, %p313_p7 }
  0x20   : > { %321 = shalt.err (!%p318_p9)
}
  0x21   : > { %268 = dma.hbm_to_vmem [thread:$0]  (!%p488_p13), %s100_s30, 128, %s102_s4, %s90_s6  }
  0x22   : > { %p107_p2 = pnand %p253_p0, %p106_p1 }
  0x23   : > { %s509_s20 = sand.u32 (!%p107_p2), 1, %s395_s12  }
  0x24   : > { %110 = sbr.rel (%p107_p2) target bundleno = 77 (0x4d), region = 24  ;;  %s254_s24 = sshll.u32 (!%p107_p2), %s509_s20, 3 }
  0x25   : > { %s113_s25 = scalar_lea.sflag (!%p107_p2), [#allocation5], %s509_s20  ;;  %s116_s26 = scalar_lea.vmem (!%p107_p2), [#allocation4], %s254_s24 }
  0x29   : > { %382 = dma.done.wait (%p466_p6), %s113_s25, 128  }
  0x2a   : > { %384 = vsyncadd (%p466_p6), %s113_s25, 4294967168  ;;  %v140_v0 = vlaneseq  ;;  %s137_s27 = sld [smem:[#allocation3]]  ;;  %s256_s28 = sshll.u32 %s444_s0, 10  ;;  %v158_v14 = vld [vmem:[%s116_s26] sm:$0xff] }
  0x2b   : > { %s258_s21 = sshll.u32 %s444_s0, 3  ;;  %s135_s6 = scalar_lea.vmem [#allocation7], %s254_s24  ;;  %v159_v16 = vmul.f32 3.0, %v158_v14 }
  0x2c   : > { %v141_v1 = vshrl.u32 %v140_v0, 7  ;;  %v143_v2 = vand.u32 127, %v140_v0  ;;  %s173_s5 = scalar_lea.hbm %s553_s2, %s258_s21  ;;  %s175_s7 = sshll.u32 %s135_s6, 4  ;;  %s176_s7 = int_to_ptr.vmem [resolvable:$true] %s175_s7 }
  0x2d   : > { %s177_s8 = sshll.u32 %s173_s5, 4  ;;  %s163_s0 = scalar_lea.sflag [#allocation6], %s509_s20  ;;  %s178_s8 = int_to_ptr.hbm [resolvable:$true] %s177_s8 }
  0x2e   : > { %v144_v3 = vmul.u32 128, %v141_v1  ;;  %s351_s9 = sshra.s32 %s178_s8, 4  ;;  %s357_s18 = scalar_lea.hbm %s553_s2, 16  ;;  %s352_s9 = int_to_ptr.hbm [resolvable:$true] %s351_s9 }
  0x2f   : > { %s353_s10 = scalar_lea.hbm %s352_s9, 8  ;;  %p358_p0 = scmp.lt.s32.totalorder %s352_s9, %s553_s2 }
  0x30   : > { %s138_s29 = smul.u32 2654435769, %s137_s27  ;;  %v145_v4 = vadd.s32 %v144_v3, %v143_v2  ;;  %p354_p6 = scmp.ne.s32.totalorder %s352_s9, %s353_s10 }
  0x31   : > { %p359_p1 = scmp.lt.s32.totalorder %s357_s18, %s353_s10 }
  0x32   : > { %s139_s30 = sadd.s32 %s256_s28, %s138_s29  ;;  %p355_p9 = pnand %p354_p6, %p473_p11 }
  0x33   : > { %v146_v5 = vstv %s139_s30  ;;  %p360_p3 = por %p359_p1, %p358_p0 }
  0x34   : > { %v147_v6 = vadd.s32 %v146_v5, %v145_v4  ;;  %p356_p13 = pneg %p355_p9 }
  0x36   : > { %v148_v7 = vshrl.u32 %v147_v6, 16  ;;  %p361_p4 = pnand %p360_p3, %p356_p13 }
  0x38   : > { %v149_v8 = vxor.u32 %v148_v7, %v147_v6 }
  0x3a   : > { %v150_v9 = vmul.u32 2146121005, %v149_v8 }
  0x3c   : > { %v151_v10 = vshrl.u32 %v150_v9, 15 }
  0x3e   : > { %v152_v11 = vxor.u32 %v151_v10, %v150_v9 }
  0x40   : > { %v153_v12 = vmul.u32 2221713035, %v152_v11 }
  0x42   : > { %v154_v13 = vshrl.u32 %v153_v12, 16 }
  0x44   : > { %v155_v15 = vxor.u32 %v154_v13, %v153_v12 }
  0x46   : > { %v156_v17 = vshrl.u32 %v155_v15, 31 }
  0x48   : > { %vm157_vm0 = vcmp.eq.s32.totalorder %v156_v17, 1 }
  0x49   : > { %v160_v18 = vsel %vm157_vm0, %v159_v16, %v158_v14 }
  0x4a   : > { %161 = vst [vmem:[%s135_s6] sm:$0xff] %v160_v18 }
  0x4b   : > { %364 = shalt.err (!%p361_p4)
}
  0x4c   : > { %263 = dma.vmem_to_hbm [thread:$0]  (%p473_p11), %s176_s7, 128, %s178_s8, %s163_s0  }
  0x4d PF: > { %s189_s20 = sand.u32 1, %s391_s11   ;;  %p559_p7 = scmp.ge.s32.totalorder %s403_s14, 2 }
  0x4e   : > { %s190_s26 = scalar_lea.sflag [#allocation6], %s189_s20 }
  0x4f   : > { %p270_p5 = pnand %p559_p7, %p477_p12 }
  0x51   : > { %p271_p8 = pneg %p270_p5 }
  0x53   : > { %386 = dma.done.wait (%p271_p8), %s190_s26, 128  }
  0x54   : > { %388 = vsyncadd (%p271_p8), %s190_s26, 4294967168  ;;  %p16_p10 = scmp.ge.s32.totalorder %s448_s16, 4   ;;  %s560_s11 = smov %s395_s12 }
  0x55   : > { %s561_s12 = smov %s399_s13  ;;  %s562_s13 = smov %s460_s19 }
  0x56   : > { %s563_s14 = smov %s448_s16  ;;  %18 = sbr.rel (!%p16_p10) target bundleno = 7 (0x7), region = 69 }
  0x5b   :  { %196 = vsyncpa [#allocation5], 1 }
  0x5c   :  { %198 = vsyncpa [#allocation5 + $0x1], 1 }
  0x5d   :  { %199 = vsyncpa [#allocation6], 1 }
  0x5e   :  { %201 = vsyncpa [#allocation6 + $0x1], 1 }

</bundles_post_ra>
